<compile_context>
chip_gen: v5e
topology: v5e:2x2
jax: 0.10.0
libtpu: 0.0.40
codegen_flags: <defaults>
</compile_context>

<pallas_src>
import functools

import jax
import jax.numpy as jnp
from jax.experimental import pallas as pl
from jax.experimental.pallas import tpu as pltpu


def _round_up(a: int, b: int) -> int:
    return (a + b - 1) // b * b


def _patch_embed_kernel(x_ref, w_ref, b_ref, o_ref):
    # x_ref: (tm, K), w_ref: (K, Npad), b_ref: (1, Npad), o_ref: (tm, Npad)
    acc = jnp.dot(x_ref[...], w_ref[...], preferred_element_type=jnp.float32)
    o_ref[...] = (acc + b_ref[...]).astype(o_ref.dtype)


def _choose_tile_m(K, n_pad, itemsize, budget_bytes=24 * 1024 * 1024):
    """Largest M tile (multiple of 128) whose VMEM footprint fits a conservative budget."""
    k_lanes = _round_up(K, 128)  # lane padding of the x block in VMEM
    k_rows = _round_up(K, 8)
    for tm in (2048, 1024, 512, 384, 256, 128):
        footprint = (
            2 * tm * k_lanes        # double-buffered x block
            + 2 * tm * n_pad        # double-buffered out block
            + 2 * k_rows * n_pad    # weight (resident; 2 buffers allocated)
            + 2 * 8 * n_pad         # bias
        ) * itemsize
        if footprint <= budget_bytes:
            return tm
    return 128


def patch_embed_1d(x, weight, bias, *, patch_size, compute_dtype=None):
    """Pallas implementation of PatchEmbed1D.forward.

    Args:
      x:      (B, C, L) input, NCL layout (same as PyTorch Conv1d input).
      weight: (E, C, patch_size) conv weight (same layout as nn.Conv1d.weight).
      bias:   (E,) conv bias.
      compute_dtype: optional matmul input dtype (e.g. jnp.bfloat16 on v6e/v7x).
    Returns:
      (B, num_patches, E) patch embeddings.
    """
    B, C, L = x.shape
    E = weight.shape[0]
    assert L % patch_size == 0, "time_len must be divisible by patch_size"
    num_patches = L // patch_size

    out_dtype = x.dtype
    if compute_dtype is not None:
        x = x.astype(compute_dtype)
        weight = weight.astype(compute_dtype)
    bias = bias.astype(jnp.float32)

    # Flatten patches: (B*P, C*ps); (c, k) ordering matches weight.reshape(E, C*ps).
    # With allow_input_fusion below, XLA can fuse this rearrange into the pallas_call
    # input DMA instead of materializing it in HBM.
    x_p = x.reshape(B, C, num_patches, patch_size)
    x_p = jnp.transpose(x_p, (0, 2, 1, 3))
    x_p = x_p.reshape(B * num_patches, C * patch_size)

    M, K = x_p.shape
    N = E
    n_pad = _round_up(N, 128)  # lane-dense output stores

    w_mat = weight.reshape(E, K).T                      # (K, N)
    if n_pad != N:
        w_mat = jnp.pad(w_mat, ((0, 0), (0, n_pad - N)))
        b_mat = jnp.pad(bias, (0, n_pad - N)).reshape(1, n_pad)
    else:
        b_mat = bias.reshape(1, n_pad)

    itemsize = jnp.dtype(x_p.dtype).itemsize
    tm = _choose_tile_m(K, n_pad, itemsize)
    if M <= tm:
        tm = _round_up(M, 8)      # single tile; keep the sublane (8) constraint
    m_pad = _round_up(M, tm)
    if m_pad != M:
        x_p = jnp.pad(x_p, ((0, m_pad - M), (0, 0)))

    grid = (m_pad // tm,)

    cost = pl.CostEstimate(
        flops=2 * M * K * N,
        transcendentals=0,
        bytes_accessed=(M * K + K * N + M * N) * itemsize,
    )

    out = pl.pallas_call(
        _patch_embed_kernel,
        out_shape=jax.ShapeDtypeStruct((m_pad, n_pad), out_dtype),
        grid_spec=pl.GridSpec(
            grid=grid,
            in_specs=[
                # NOTE: with tiny K (= C*patch_size) the x block lane dim pads to 128 in
                # VMEM; production shapes (in_chans*patch_size >= 128) are lane-dense.
                pl.BlockSpec((tm, K), lambda i: (i, 0)),        # streamed x tile
                pl.BlockSpec((K, n_pad), lambda i: (0, 0)),     # resident weight
                pl.BlockSpec((1, n_pad), lambda i: (0, 0)),     # resident bias
            ],
            out_specs=pl.BlockSpec((tm, n_pad), lambda i: (i, 0)),
        ),
        compiler_params=pltpu.CompilerParams(
            dimension_semantics=("parallel",),
            vmem_limit_bytes=48 * 1024 * 1024,
            allow_input_fusion=[True, False, False],
        ),
        cost_estimate=cost,
    )(x_p, w_mat, b_mat)

    if m_pad != M or n_pad != N:
        out = out[:M, :N]
    return out.reshape(B, num_patches, E)


def _reference(x, weight, bias, *, patch_size):
    """Plain-JAX reference: strided Conv1d + transpose(1, 2)."""
    B, C, L = x.shape
    P = L // patch_size
    xp = x.reshape(B, C, P, patch_size)
    # out[b, p, e] = sum_{c,k} x[b, c, p*ps + k] * w[e, c, k] + bias[e]
    return jnp.einsum("bcpk,eck->bpe", xp, weight) + bias[None, None, :]


if __name__ == "__main__":
    # Small shapes consistent with the module's forward:
    #   batch=2, in_chans=4, time_len=16, patch_size=2, embed_dim=32
    B, C, L = 2, 4, 16
    patch_size = 2
    embed_dim = 32

    key = jax.random.PRNGKey(0)
    kx, kw, kb = jax.random.split(key, 3)

    x = jax.random.normal(kx, (B, C, L), dtype=jnp.float32)

    # Deterministic parameter init (uniform, roughly matching PyTorch Conv1d init scale).
    fan_in = C * patch_size
    bound = 1.0 / (fan_in ** 0.5)
    weight = jax.random.uniform(kw, (embed_dim, C, patch_size),
                                minval=-bound, maxval=bound, dtype=jnp.float32)
    bias = jax.random.uniform(kb, (embed_dim,),
                              minval=-bound, maxval=bound, dtype=jnp.float32)

    fwd = jax.jit(functools.partial(patch_embed_1d, patch_size=patch_size))
    out = jax.block_until_ready(fwd(x, weight, bias))

    ref = _reference(x, weight, bias, patch_size=patch_size)
    assert out.shape == (B, L // patch_size, embed_dim), out.shape
    assert jnp.allclose(out, ref, atol=1e-5, rtol=1e-5), "mismatch vs reference"

    print("KERNEL_OK")
</pallas_src>

<mosaic_0001>
module attributes {stable_mosaic.version = 11 : i64} {
  func.func @_patch_embed_kernel(%arg0: i32, %arg1: memref<16x8xf32, #tpu.memory_space<vmem>>, %arg2: memref<8x128xf32, #tpu.memory_space<vmem>>, %arg3: memref<1x128xf32, #tpu.memory_space<vmem>>, %arg4: memref<16x128xf32, #tpu.memory_space<vmem>>) attributes {dimension_semantics = [#tpu.dimension_semantics<parallel>], iteration_bounds = array<i64: 1>, scalar_prefetch = 0 : i64, scratch_operands = 0 : i64, tpu.core_type = #tpu.core_type<tc>, window_params = [{transform_indices = @transform_0, window_bounds = array<i64: 16, 8>}, {pipeline_mode = #tpu.pipeline_mode<synchronous>, transform_indices = @transform_1, window_bounds = array<i64: 8, 128>}, {pipeline_mode = #tpu.pipeline_mode<synchronous>, transform_indices = @transform_2, window_bounds = array<i64: 1, 128>}, {transform_indices = @transform_3, window_bounds = array<i64: 16, 128>}]} {
    %c0 = arith.constant 0 : index
    %c0_0 = arith.constant 0 : index
    %0 = vector.load %arg1[%c0, %c0_0] : memref<16x8xf32, #tpu.memory_space<vmem>>, vector<16x8xf32>
    %c0_1 = arith.constant 0 : index
    %c0_2 = arith.constant 0 : index
    %1 = vector.load %arg2[%c0_1, %c0_2] : memref<8x128xf32, #tpu.memory_space<vmem>>, vector<8x128xf32>
    %cst = arith.constant dense<0.000000e+00> : vector<16x128xf32>
    %2 = tpu.matmul %0, %1, %cst {dimension_numbers = #tpu.dot_dimension_numbers<[1], [0], [0], [1], [0, 0, 1, 1], [], []>} : vector<16x8xf32>, vector<8x128xf32>, vector<16x128xf32> -> vector<16x128xf32>
    %c0_3 = arith.constant 0 : index
    %c0_4 = arith.constant 0 : index
    %3 = vector.load %arg3[%c0_3, %c0_4] : memref<1x128xf32, #tpu.memory_space<vmem>>, vector<1x128xf32>
    %4 = vector.broadcast %3 : vector<1x128xf32> to vector<16x128xf32>
    %5 = arith.addf %2, %4 : vector<16x128xf32>
    %c0_5 = arith.constant 0 : index
    %c0_6 = arith.constant 0 : index
    %6 = vector.load %arg4[%c0_5, %c0_6] : memref<16x128xf32, #tpu.memory_space<vmem>>, vector<16x128xf32>
    tpu.vector_store %arg4[%c0_5, %c0_6], %5 {strides = array<i32>} : memref<16x128xf32, #tpu.memory_space<vmem>>, vector<16x128xf32>,
    return
  }
  func.func @transform_0(%arg0: i32) -> (i32, i32) {
    %c0_i32 = arith.constant 0 : i32
    %c0_i32_0 = arith.constant 0 : i32
    return %arg0, %c0_i32 : i32, i32
  }
  func.func @transform_1(%arg0: i32) -> (i32, i32) {
    %c0_i32 = arith.constant 0 : i32
    %c0_i32_0 = arith.constant 0 : i32
    %c0_i32_1 = arith.constant 0 : i32
    return %c0_i32, %c0_i32_0 : i32, i32
  }
  func.func @transform_2(%arg0: i32) -> (i32, i32) {
    %c0_i32 = arith.constant 0 : i32
    %c0_i32_0 = arith.constant 0 : i32
    %c0_i32_1 = arith.constant 0 : i32
    return %c0_i32, %c0_i32_0 : i32, i32
  }
  func.func @transform_3(%arg0: i32) -> (i32, i32) {
    %c0_i32 = arith.constant 0 : i32
    %c0_i32_0 = arith.constant 0 : i32
    return %arg0, %c0_i32 : i32, i32
  }
}

</mosaic_0001>

<bundles_post_ra>
// kernel: patch_embed_1d.1
= control target key start
LH: loop header
LB: loop body
LE: loop exit
PB: predicated region body
PF: predicated region fallthrough
CT: control target
= control target key end

     0   :  { %vm21_vm0 = vcmask 64512   ;;  %s99_s1 = inlined_call_operand.vmem [shape: f32[8,128], index: 1, kind: input, shape index: {}]   ;;  %s100_s0 = inlined_call_operand.vmem [shape: f32[16,8], index: 0, kind: input, shape index: {}]   ;;  %s101_s2 = inlined_call_operand.vmem [shape: f32[1,128], index: 2, kind: input, shape index: {}]   ;;  %s102_s3 = inlined_call_operand.vmem [shape: f32[16,128], index: 3, kind: output, shape index: {}]  }
   0x1   :  { %v16_v0 = vld [vmem:[%s99_s1] sm:$0xff]  ;;  %v15_v2 = vld [vmem:[%s100_s0 + $0x8] sm:$0xff] }
   0x2   :  { %v14_v1 = vld [vmem:[%s100_s0] sm:$0xff]  ;;  %43 = vmatpush.msra.mxu0 %v16_v0  ;;  %59 = vmatpush.msra.mxu1 %v16_v0 }
   0x3   :  { %57 = vmatmul.msk.f32.vlgmr.msra.gmra.mxu0 %vm21_vm0, %v14_v1  ;;  %58 = vmatmul.msk.f32.vlgmr.msra.gmra.mxu1 %vm21_vm0, %v15_v2  ;;  %v60_v3 = vld [vmem:[%s101_s2] ss:$0 sm:$0xff] }
  0x80   :  { %v45_v4 = vpop.f32.mrf.mxu0  ;;  %v48_v5 = vpop.f32.mrf.mxu1 }
  0x81   :  { %v46_v6 = vadd.f32 %v60_v3, %v45_v4  ;;  %v49_v7 = vadd.f32 %v60_v3, %v48_v5 }
  0x83   :  { %51 = vst [vmem:[%s102_s3] sm:$0xff] %v46_v6 }
  0x84   :  { %52 = vst [vmem:[%s102_s3 + $0x8] sm:$0xff] %v49_v7 }

</bundles_post_ra>
